<compile_context>
chip_gen: v5e
topology: v5e:2x2
jax: 0.10.0
libtpu: 0.0.40
codegen_flags: <defaults>
</compile_context>

<pallas_src>
import jax
import jax.numpy as jnp
from jax.experimental import pallas as pl
from jax.experimental.pallas import tpu as pltpu


_LANE = 128
_MAX_TILE = 1024
# Double-buffered (in + out) block footprint budget: comfortably under v5e's
# 16 MiB default scoped VMEM and far under v6e/v7x's 32 MiB default.
_VMEM_BUDGET = 8 * 1024 * 1024


# ----------------------------------------------------------------------------
# Kernel: transpose nb independent (tc, tl) tiles -> (tl, tc).  nb is a small
# static block count, so the Python loop fully unrolls into nb XLU transposes;
# DMA in/out is handled by the BlockSpec pipeline (double buffered).
# ----------------------------------------------------------------------------
def _permute021_kernel(x_ref, o_ref):
    # x_ref: (nb, tc, tl)   o_ref: (nb, tl, tc)
    for i in range(x_ref.shape[0]):     # nb <= 8, static: unrolled
        o_ref[i] = x_ref[i].T


# ----------------------------------------------------------------------------
# Tile selection helpers.
# ----------------------------------------------------------------------------
def _round_up(x, m):
    return -(-x // m) * m


def _sublane(itemsize):
    # Second-minor packing granularity: 8 (f32), 16 (bf16), 32 (int8).
    return 8 * max(1, 4 // itemsize)


def _block_vmem_bytes(shape, itemsize):
    """Approximate VMEM bytes for one buffer holding `shape` (layout-aware):
    last dim padded to 128 lanes, second-minor to the packed sublane count."""
    *lead, s, l = shape
    n = 1
    for d in lead:
        n *= d
    return n * _round_up(s, _sublane(itemsize)) * _round_up(l, _LANE) * itemsize


def _footprint(nb, tc, tl, itemsize):
    # Two pipeline buffers for the input block + two for the output block.
    return 2 * (_block_vmem_bytes((nb, tc, tl), itemsize)
                + _block_vmem_bytes((nb, tl, tc), itemsize))


def _tile_candidates(dim):
    """Lane-aligned tile candidates for one axis (largest first)."""
    if dim <= _LANE:
        return [dim]                      # full (small) dim: always legal
    cap = min(_MAX_TILE, _round_up(dim, _LANE))
    return list(range(cap, 0, -_LANE))    # cap, cap-128, ..., 128


def _choose_tiles(N, C, L, itemsize):
    """Pick (nb, tc, tl) maximizing tile size under the VMEM budget."""
    best = None
    for tc in _tile_candidates(C):
        for tl in _tile_candidates(L):
            if _footprint(1, tc, tl, itemsize) > _VMEM_BUDGET:
                continue
            key = (tc * tl, min(tc, tl))  # bigger tiles, then squarer tiles
            if best is None or key > best[0]:
                best = (key, tc, tl)
    assert best is not None               # 128x128 (or smaller) always fits
    _, tc, tl = best

    # Amortize per-grid-step overhead for small per-batch tiles by blocking
    # several batch elements per step.  nb divides N so the (well-trodden)
    # ragged masking is only ever needed on the trailing two dims.
    nb = 1
    payload = 2 * tc * tl * itemsize      # useful bytes moved per step (nb=1)
    if payload < (1 << 20):
        for cand in range(min(N, 8), 1, -1):
            if (N % cand == 0
                    and _footprint(cand, tc, tl, itemsize) <= _VMEM_BUDGET
                    and cand * payload <= (4 << 20)):
                nb = cand
                break
    return nb, tc, tl


# ----------------------------------------------------------------------------
# Wrapper: (N, C, L) -> (N, L, C), identical values (torch permute(0,2,1)).
# ----------------------------------------------------------------------------
def sequential_view(x):
    N, C, L = x.shape
    itemsize = jnp.dtype(x.dtype).itemsize
    nb, tc, tl = _choose_tiles(N, C, L, itemsize)

    extents = {"n": pl.cdiv(N, nb), "c": pl.cdiv(C, tc), "l": pl.cdiv(L, tl)}
    # Largest grid axis leading -> even megacore split on v7x; all axes are
    # independent (pure scatter of distinct output blocks), so any order is
    # valid and every axis is "parallel".
    order = sorted(extents, key=lambda k: extents[k], reverse=True)
    pos = {k: i for i, k in enumerate(order)}
    grid = tuple(extents[k] for k in order)

    def in_map(*g):
        return (g[pos["n"]], g[pos["c"]], g[pos["l"]])

    def out_map(*g):
        return (g[pos["n"]], g[pos["l"]], g[pos["c"]])

    return pl.pallas_call(
        _permute021_kernel,
        out_shape=jax.ShapeDtypeStruct((N, L, C), x.dtype),
        grid=grid,
        in_specs=[pl.BlockSpec((nb, tc, tl), in_map)],
        out_specs=pl.BlockSpec((nb, tl, tc), out_map),
        compiler_params=pltpu.CompilerParams(
            dimension_semantics=("parallel",) * len(grid)),
        cost_estimate=pl.CostEstimate(
            flops=0,
            transcendentals=0,
            bytes_accessed=2 * N * C * L * itemsize),
    )(x)


if __name__ == "__main__":
    key = jax.random.PRNGKey(0)
    k1, k2, k3 = jax.random.split(key, 3)

    # Shape implied by the module: (batch, channels, length) = (2, 4, 16).
    x_small = jax.random.normal(k1, (2, 4, 16), jnp.float32)
    out_small = jax.block_until_ready(sequential_view(x_small))
    assert out_small.shape == (2, 16, 4), out_small.shape
    assert bool(jnp.array_equal(out_small, jnp.transpose(x_small, (0, 2, 1))))

    # Lane-aligned dims: exercises the clean 128-multiple tiled path.
    x_big = jax.random.normal(k2, (2, 256, 384), jnp.float32)
    out_big = jax.block_until_ready(sequential_view(x_big))
    assert out_big.shape == (2, 384, 256), out_big.shape
    assert bool(jnp.array_equal(out_big, jnp.transpose(x_big, (0, 2, 1))))

    # Non-128-multiple dims: exercises the cdiv grid + ragged-tail masking
    # that replaced the old full-dim fallback.
    x_ragged = jax.random.normal(k3, (3, 200, 260), jnp.float32)
    out_ragged = jax.block_until_ready(sequential_view(x_ragged))
    assert out_ragged.shape == (3, 260, 200), out_ragged.shape
    assert bool(jnp.array_equal(out_ragged, jnp.transpose(x_ragged, (0, 2, 1))))

    print("KERNEL_OK")
</pallas_src>

<mosaic_0001>
module attributes {stable_mosaic.version = 11 : i64} {
  func.func @_permute021_kernel(%arg0: i32, %arg1: i32, %arg2: i32, %arg3: memref<2x4x16xf32, #tpu.memory_space<vmem>>, %arg4: memref<2x16x4xf32, #tpu.memory_space<vmem>>) attributes {dimension_semantics = [#tpu.dimension_semantics<parallel>, #tpu.dimension_semantics<parallel>, #tpu.dimension_semantics<parallel>], iteration_bounds = array<i64: 1, 1, 1>, scalar_prefetch = 0 : i64, scratch_operands = 0 : i64, tpu.core_type = #tpu.core_type<tc>, window_params = [{transform_indices = @transform_0, window_bounds = array<i64: 2, 4, 16>}, {transform_indices = @transform_1, window_bounds = array<i64: 2, 16, 4>}]} {
    %c0 = arith.constant 0 : index
    %c0_0 = arith.constant 0 : index
    %c0_1 = arith.constant 0 : index
    %0 = vector.load %arg3[%c0, %c0_0, %c0_1] : memref<2x4x16xf32, #tpu.memory_space<vmem>>, vector<1x4x16xf32>
    %1 = vector.shape_cast %0 : vector<1x4x16xf32> to vector<4x16xf32>
    %2 = tpu.transpose %1, [1, 0] : vector<4x16xf32> -> vector<16x4xf32>
    %c0_2 = arith.constant 0 : index
    %c0_3 = arith.constant 0 : index
    %c0_4 = arith.constant 0 : index
    %3 = vector.load %arg4[%c0_2, %c0_3, %c0_4] : memref<2x16x4xf32, #tpu.memory_space<vmem>>, vector<1x16x4xf32>
    %4 = vector.shape_cast %3 : vector<1x16x4xf32> to vector<16x4xf32>
    %5 = vector.shape_cast %2 : vector<16x4xf32> to vector<1x16x4xf32>
    tpu.vector_store %arg4[%c0_2, %c0_3, %c0_4], %5 {strides = array<i32>} : memref<2x16x4xf32, #tpu.memory_space<vmem>>, vector<1x16x4xf32>,
    %c1 = arith.constant 1 : index
    %c0_5 = arith.constant 0 : index
    %c0_6 = arith.constant 0 : index
    %6 = vector.load %arg3[%c1, %c0_5, %c0_6] : memref<2x4x16xf32, #tpu.memory_space<vmem>>, vector<1x4x16xf32>
    %7 = vector.shape_cast %6 : vector<1x4x16xf32> to vector<4x16xf32>
    %8 = tpu.transpose %7, [1, 0] : vector<4x16xf32> -> vector<16x4xf32>
    %c1_7 = arith.constant 1 : index
    %c0_8 = arith.constant 0 : index
    %c0_9 = arith.constant 0 : index
    %9 = vector.load %arg4[%c1_7, %c0_8, %c0_9] : memref<2x16x4xf32, #tpu.memory_space<vmem>>, vector<1x16x4xf32>
    %10 = vector.shape_cast %9 : vector<1x16x4xf32> to vector<16x4xf32>
    %11 = vector.shape_cast %8 : vector<16x4xf32> to vector<1x16x4xf32>
    tpu.vector_store %arg4[%c1_7, %c0_8, %c0_9], %11 {strides = array<i32>} : memref<2x16x4xf32, #tpu.memory_space<vmem>>, vector<1x16x4xf32>,
    return
  }
  func.func @transform_0(%arg0: i32, %arg1: i32, %arg2: i32) -> (i32, i32, i32) {
    %c0_i32 = arith.constant 0 : i32
    return %arg0, %arg1, %arg2 : i32, i32, i32
  }
  func.func @transform_1(%arg0: i32, %arg1: i32, %arg2: i32) -> (i32, i32, i32) {
    %c0_i32 = arith.constant 0 : i32
    return %arg0, %arg2, %arg1 : i32, i32, i32
  }
}

</mosaic_0001>

<bundles_post_ra>
// kernel: tpu_custom_call.1
= control target key start
LH: loop header
LB: loop body
LE: loop exit
PB: predicated region body
PF: predicated region fallthrough
CT: control target
= control target key end

     0   :  { %6 = vsyncpa [#allocation3], 0  ;;  %s134_s9 = smov [#allocation2]   ;;  %s135_s11 = smov 64   ;;  %s162_s0 = inlined_call_operand.hbm [shape: f32[2,4,16], index: 0, kind: input, shape index: {}]   ;;  %s163_s1 = inlined_call_operand.vmem [shape: f32[2,16,4], index: 1, kind: output, shape index: {}]  }
   0x1   :  { %s11_s8 = sshll.u32 %s162_s0, 4  ;;  %s13_s10 = sshll.u32 %s134_s9, 4  ;;  %s12_s8 = int_to_ptr.hbm [resolvable:$true] %s11_s8  ;;  %s14_s10 = int_to_ptr.vmem [resolvable:$true] %s13_s10 }
   0x2   :  { %s136_s12 = smov 4  }
   0x3   :  { %19 = dma.hbm_to_vmem [thread:$0]  %s12_s8, 128, %s14_s10, [#allocation3], %s135_s11, %s135_s11, %s136_s12  }
   0x4   :  { %132 = dma.done.wait [#allocation3], 128  }
   0x5   :  { %133 = vsyncadd [#allocation3], 4294967168  ;;  %v24_v0 = vld [vmem:[#allocation2] sm:$0xf]  ;;  %v61_v1 = vld [vmem:[#allocation2 + $0x4] sm:$0xf] }
   0x6   :  { %25 = vxpose.xlu0.b32.start.end [1/1] (short) (narrow) %v24_v0, 16  ;;  %vm57_vm0 = vcmask 31744  }
  0x16   :  { %62 = vxpose.xlu0.b32.start.end [1/1] (short) (narrow) %v61_v1, 16 }
  0xaa   :  { %v41_v2 = vpop.trf.xlu0 }
  0xab   :  { %58 = vst.msk [vmem:[%s163_s1] sm:$0xff] %vm57_vm0, %v41_v2 }
  0xb2   :  { %v42_v3 = vpop.trf.xlu0 }
  0xb3   :  { %59 = vst.msk [vmem:[%s163_s1 + $0x8] sm:$0xff] %vm57_vm0, %v42_v3 }
  0xba   :  { %v78_v4 = vpop.trf.xlu0 }
  0xbb   :  { %102 = vst.msk [vmem:[%s163_s1 + $0x10] sm:$0xff] %vm57_vm0, %v78_v4 }
  0xc2   :  { %v79_v5 = vpop.trf.xlu0 }
  0xc3   :  { %103 = vst.msk [vmem:[%s163_s1 + $0x18] sm:$0xff] %vm57_vm0, %v79_v5 }
  0xc4   :  { %101 = vsyncpa [#allocation3], 1 }

</bundles_post_ra>
